<compile_context>
chip_gen: v5e
topology: v5e:2x2
jax: 0.10.0
libtpu: 0.0.40
codegen_flags: <defaults>
</compile_context>

<pallas_src>
import math
from collections import OrderedDict

import jax
import jax.numpy as jnp
from jax.experimental import pallas as pl
from jax.experimental.pallas import tpu as pltpu


# ----------------------------------------------------------------------------
# Pallas kernel: the entire HyperNetwork forward in one step, 3 MXU calls.
# All refs live fully in VMEM (no tiling needed at these sizes).
# ----------------------------------------------------------------------------
def fused_hyper_kernel(z_ref, w0_ref, b0_ref, w1_ref, b1_ref, w2_ref, b2_ref,
                       out_ref):
    # layer 0: all P hypernets fused along lanes: (Bp, latent) @ (latent, P*H)
    h = jnp.dot(z_ref[...], w0_ref[...],
                preferred_element_type=jnp.float32) + b0_ref[...]
    h = jnp.maximum(h, 0.0)

    # layer 1: block-diagonal weight packs P independent (H,H) matmuls into one
    h = jnp.dot(h, w1_ref[...],
                preferred_element_type=jnp.float32) + b1_ref[...]
    h = jnp.maximum(h, 0.0)

    # outermost linear: block-diagonal (P*H, P*out_pad) -> lane-dense output
    o = jnp.dot(h, w2_ref[...],
                preferred_element_type=jnp.float32) + b2_ref[...]
    out_ref[...] = o.astype(out_ref.dtype)


def fused_hyper_mlp(z_pad, w0cat, b0cat, w1bd, b1cat, w2bd, b2cat):
    """Single pallas_call for the whole HyperNetwork forward.

    z_pad : (Bp, latent)        (batch zero-padded to a multiple of 8)
    w0cat : (latent, P*H)       b0cat : (1, P*H)
    w1bd  : (P*H, P*H)          b1cat : (1, P*H)     (block-diagonal)
    w2bd  : (P*H, P*out_pad)    b2cat : (1, P*out_pad)  (block-diagonal, padded)
    returns (Bp, P*out_pad)
    """
    Bp = z_pad.shape[0]
    out_w = w2bd.shape[-1]
    vmem = pl.BlockSpec(memory_space=pltpu.MemorySpace.VMEM)
    return pl.pallas_call(
        fused_hyper_kernel,
        out_shape=jax.ShapeDtypeStruct((Bp, out_w), jnp.float32),
        in_specs=[vmem] * 7,
        out_specs=vmem,
    )(z_pad, w0cat, b0cat, w1bd, b1cat, w2bd, b2cat)


# ----------------------------------------------------------------------------
# Deterministic parameter construction (mirrors the PyTorch init schemes).
# ----------------------------------------------------------------------------
def kaiming_normal_fan_in_relu(key, shape):
    # shape = (out_features, in_features); fan_in = in_features
    fan_in = shape[-1]
    std = math.sqrt(2.0) / math.sqrt(fan_in)
    return std * jax.random.normal(key, shape, dtype=jnp.float32)


def make_hypernet_params(key, hyper_in, hyper_hidden, out_dim, param_name,
                         hypo_last_dim):
    """Params for one FCBlock hypernet (PyTorch layout: W is (out, in))."""
    keys = jax.random.split(key, 6)

    w0 = kaiming_normal_fan_in_relu(keys[0], (hyper_hidden, hyper_in))
    b0 = jax.random.uniform(keys[1], (1, hyper_hidden), dtype=jnp.float32,
                            minval=-1.0 / math.sqrt(hyper_in),
                            maxval=1.0 / math.sqrt(hyper_in))
    w1 = kaiming_normal_fan_in_relu(keys[2], (hyper_hidden, hyper_hidden))
    b1 = jax.random.uniform(keys[3], (1, hyper_hidden), dtype=jnp.float32,
                            minval=-1.0 / math.sqrt(hyper_hidden),
                            maxval=1.0 / math.sqrt(hyper_hidden))

    # last layer: hyper_weight_init / hyper_bias_init
    w2 = kaiming_normal_fan_in_relu(keys[4], (out_dim, hyper_hidden)) / 100.0
    if "weight" in param_name:
        bound = 1.0 / hypo_last_dim       # hyper_weight_init
    else:
        bound = 1.0 / hyper_hidden        # hyper_bias_init (fan_in of last layer)
    b2 = jax.random.uniform(keys[5], (1, out_dim), dtype=jnp.float32,
                            minval=-bound, maxval=bound)
    return (w0, b0, w1, b1, w2, b2)


def hypo_fcblock_param_shapes(in_features=2, out_features=1,
                              num_hidden_layers=1, hidden_features=16):
    """meta_named_parameters() of FCBlock(in, out, num_hidden_layers, hidden)."""
    shapes = OrderedDict()
    shapes["net.0.0.weight"] = (hidden_features, in_features)
    shapes["net.0.0.bias"] = (hidden_features,)
    for i in range(num_hidden_layers):
        shapes[f"net.{i + 1}.0.weight"] = (hidden_features, hidden_features)
        shapes[f"net.{i + 1}.0.bias"] = (hidden_features,)
    last = num_hidden_layers + 1
    shapes[f"net.{last}.0.weight"] = (out_features, hidden_features)
    shapes[f"net.{last}.0.bias"] = (out_features,)
    return shapes


def pack_hyper_params(hyper_params, param_shapes, hyper_hidden):
    """Pack the P hypernet MLPs into concat (layer 0) + block-diagonal
    (layers 1 and 2) matrices, pre-transposed to (in, out), last layer
    zero-padded per param to a common lane-dense width out_pad."""
    names = list(param_shapes.keys())
    out_dims = [int(math.prod(param_shapes[n])) for n in names]
    out_pad = max(128, ((max(out_dims) + 127) // 128) * 128)
    H = hyper_hidden

    w0t_l, b0_l, w1t_l, b1_l, w2t_l, b2_l = [], [], [], [], [], []
    for name, od in zip(names, out_dims):
        w0, b0, w1, b1, w2, b2 = hyper_params[name]
        w0t_l.append(w0.T)                                            # (latent, H)
        b0_l.append(b0)                                               # (1, H)
        w1t_l.append(w1.T)                                            # (H, H)
        b1_l.append(b1)                                               # (1, H)
        w2t_l.append(jnp.pad(w2.T, ((0, 0), (0, out_pad - od))))      # (H, out_pad)
        b2_l.append(jnp.pad(b2, ((0, 0), (0, out_pad - od))))         # (1, out_pad)

    w0cat = jnp.concatenate(w0t_l, axis=1)                            # (latent, P*H)
    b0cat = jnp.concatenate(b0_l, axis=1)                             # (1, P*H)
    w1bd = jax.scipy.linalg.block_diag(*w1t_l)                        # (P*H, P*H)
    b1cat = jnp.concatenate(b1_l, axis=1)                             # (1, P*H)
    w2bd = jax.scipy.linalg.block_diag(*w2t_l)                        # (P*H, P*out_pad)
    b2cat = jnp.concatenate(b2_l, axis=1)                             # (1, P*out_pad)

    packed = (w0cat, b0cat, w1bd, b1cat, w2bd, b2cat)
    return packed, out_dims, out_pad


def hypernetwork_forward(z, packed, param_shapes, out_dims, out_pad):
    """HyperNetwork.forward: one fused kernel call, then slice/reshape glue."""
    batch = z.shape[0]
    Bp = max(8, ((batch + 7) // 8) * 8)          # pad batch to 8 sublanes
    z_pad = jnp.zeros((Bp, z.shape[1]), z.dtype).at[:batch].set(z)

    raw = fused_hyper_mlp(z_pad, *packed)        # (Bp, P*out_pad)

    out = OrderedDict()
    for i, (name, shape) in enumerate(param_shapes.items()):
        cols = raw[:batch, i * out_pad: i * out_pad + out_dims[i]]
        out[name] = cols.reshape((-1,) + tuple(shape))
    return out


def hypernetwork_forward_ref(z, hyper_params, param_shapes):
    """Pure-JAX reference (same math as PyTorch: x @ W.T + b) for checking."""
    out = OrderedDict()
    for name, shape in param_shapes.items():
        w0, b0, w1, b1, w2, b2 = hyper_params[name]
        h = jnp.maximum(z @ w0.T + b0, 0.0)
        h = jnp.maximum(h @ w1.T + b1, 0.0)
        raw = h @ w2.T + b2
        out[name] = raw.reshape((-1,) + tuple(shape))
    return out


if __name__ == "__main__":
    # Small, forward-consistent sizes:
    batch = 2
    hyper_in_features = 8          # latent dim of z
    hyper_hidden_features = 32

    param_shapes = hypo_fcblock_param_shapes(
        in_features=2, out_features=1, num_hidden_layers=1, hidden_features=16)

    key = jax.random.PRNGKey(0)
    key, zkey = jax.random.split(key)
    z = jax.random.normal(zkey, (batch, hyper_in_features), dtype=jnp.float32)

    hyper_params = OrderedDict()
    for name, shape in param_shapes.items():
        key, pkey = jax.random.split(key)
        out_dim = int(math.prod(shape))
        hypo_last_dim = shape[-1]
        hyper_params[name] = make_hypernet_params(
            pkey, hyper_in_features, hyper_hidden_features, out_dim, name,
            hypo_last_dim)

    packed, out_dims, out_pad = pack_hyper_params(
        hyper_params, param_shapes, hyper_hidden_features)

    result = hypernetwork_forward(z, packed, param_shapes, out_dims, out_pad)
    result = jax.tree_util.tree_map(jax.block_until_ready, result)

    # sanity check against pure-JAX reference (validates the block-diagonal
    # repacking of layers 1/2, per the review's correctness note)
    ref = hypernetwork_forward_ref(z, hyper_params, param_shapes)
    for name in param_shapes:
        assert result[name].shape == (batch,) + tuple(param_shapes[name])
        assert jnp.allclose(result[name], ref[name], atol=1e-5, rtol=1e-5)

    print("KERNEL_OK")
</pallas_src>

<mosaic_0001>
module attributes {stable_mosaic.version = 11 : i64} {
  func.func @fused_hyper_kernel(%arg0: memref<8x8xf32, #tpu.memory_space<vmem>>, %arg1: memref<8x192xf32, #tpu.memory_space<vmem>>, %arg2: memref<1x192xf32, #tpu.memory_space<vmem>>, %arg3: memref<192x192xf32, #tpu.memory_space<vmem>>, %arg4: memref<1x192xf32, #tpu.memory_space<vmem>>, %arg5: memref<192x1536xf32, #tpu.memory_space<vmem>>, %arg6: memref<1x1536xf32, #tpu.memory_space<vmem>>, %arg7: memref<8x1536xf32, #tpu.memory_space<vmem>>) attributes {dimension_semantics = [], scalar_prefetch = 0 : i64, scratch_operands = 0 : i64, tpu.core_type = #tpu.core_type<tc>} {
    %c0 = arith.constant 0 : index
    %c0_0 = arith.constant 0 : index
    %0 = vector.load %arg0[%c0, %c0_0] : memref<8x8xf32, #tpu.memory_space<vmem>>, vector<8x8xf32>
    %c0_1 = arith.constant 0 : index
    %c0_2 = arith.constant 0 : index
    %1 = vector.load %arg1[%c0_1, %c0_2] : memref<8x192xf32, #tpu.memory_space<vmem>>, vector<8x192xf32>
    %cst = arith.constant dense<0.000000e+00> : vector<8x192xf32>
    %2 = tpu.matmul %0, %1, %cst {dimension_numbers = #tpu.dot_dimension_numbers<[1], [0], [0], [1], [0, 0, 1, 1], [], []>} : vector<8x8xf32>, vector<8x192xf32>, vector<8x192xf32> -> vector<8x192xf32>
    %c0_3 = arith.constant 0 : index
    %c0_4 = arith.constant 0 : index
    %3 = vector.load %arg2[%c0_3, %c0_4] : memref<1x192xf32, #tpu.memory_space<vmem>>, vector<1x192xf32>
    %4 = vector.broadcast %3 : vector<1x192xf32> to vector<8x192xf32>
    %5 = arith.addf %2, %4 : vector<8x192xf32>
    %cst_5 = arith.constant 0.000000e+00 : f32
    %6 = vector.broadcast %cst_5 : f32 to vector<8x192xf32>
    %7 = arith.maximumf %5, %6 : vector<8x192xf32>
    %c0_6 = arith.constant 0 : index
    %c0_7 = arith.constant 0 : index
    %8 = vector.load %arg3[%c0_6, %c0_7] : memref<192x192xf32, #tpu.memory_space<vmem>>, vector<192x192xf32>
    %cst_8 = arith.constant dense<0.000000e+00> : vector<8x192xf32>
    %9 = tpu.matmul %7, %8, %cst_8 {dimension_numbers = #tpu.dot_dimension_numbers<[1], [0], [0], [1], [0, 0, 1, 1], [], []>} : vector<8x192xf32>, vector<192x192xf32>, vector<8x192xf32> -> vector<8x192xf32>
    %c0_9 = arith.constant 0 : index
    %c0_10 = arith.constant 0 : index
    %10 = vector.load %arg4[%c0_9, %c0_10] : memref<1x192xf32, #tpu.memory_space<vmem>>, vector<1x192xf32>
    %11 = vector.broadcast %10 : vector<1x192xf32> to vector<8x192xf32>
    %12 = arith.addf %9, %11 : vector<8x192xf32>
    %cst_11 = arith.constant 0.000000e+00 : f32
    %13 = vector.broadcast %cst_11 : f32 to vector<8x192xf32>
    %14 = arith.maximumf %12, %13 : vector<8x192xf32>
    %c0_12 = arith.constant 0 : index
    %c0_13 = arith.constant 0 : index
    %15 = vector.load %arg5[%c0_12, %c0_13] : memref<192x1536xf32, #tpu.memory_space<vmem>>, vector<192x1536xf32>
    %cst_14 = arith.constant dense<0.000000e+00> : vector<8x1536xf32>
    %16 = tpu.matmul %14, %15, %cst_14 {dimension_numbers = #tpu.dot_dimension_numbers<[1], [0], [0], [1], [0, 0, 1, 1], [], []>} : vector<8x192xf32>, vector<192x1536xf32>, vector<8x1536xf32> -> vector<8x1536xf32>
    %c0_15 = arith.constant 0 : index
    %c0_16 = arith.constant 0 : index
    %17 = vector.load %arg6[%c0_15, %c0_16] : memref<1x1536xf32, #tpu.memory_space<vmem>>, vector<1x1536xf32>
    %18 = vector.broadcast %17 : vector<1x1536xf32> to vector<8x1536xf32>
    %19 = arith.addf %16, %18 : vector<8x1536xf32>
    %c0_17 = arith.constant 0 : index
    %c0_18 = arith.constant 0 : index
    %20 = vector.load %arg7[%c0_17, %c0_18] : memref<8x1536xf32, #tpu.memory_space<vmem>>, vector<8x1536xf32>
    tpu.vector_store %arg7[%c0_17, %c0_18], %19 {strides = array<i32>} : memref<8x1536xf32, #tpu.memory_space<vmem>>, vector<8x1536xf32>,
    return
  }
}

</mosaic_0001>

<bundles_post_ra>
// kernel: tpu_custom_call.1
= control target key start
LH: loop header
LB: loop body
LE: loop exit
PB: predicated region body
PF: predicated region fallthrough
CT: control target
= control target key end

     0   :  { %12 = vsyncpa [#allocation3], 0  ;;  %s1500_s0 = inlined_call_operand.hbm [shape: f32[8,8], index: 0, kind: input, shape index: {}]   ;;  %s1501_s1 = inlined_call_operand.hbm [shape: f32[8,192], index: 1, kind: input, shape index: {}]   ;;  %s1502_s2 = inlined_call_operand.hbm [shape: f32[1,192], index: 2, kind: input, shape index: {}]   ;;  %s1503_s3 = inlined_call_operand.hbm [shape: f32[192,192], index: 3, kind: input, shape index: {}]   ;;  %s1504_s4 = inlined_call_operand.hbm [shape: f32[1,192], index: 4, kind: input, shape index: {}]   ;;  %s1505_s5 = inlined_call_operand.hbm [shape: f32[192,1536], index: 5, kind: input, shape index: {}]   ;;  %s1506_s6 = inlined_call_operand.hbm [shape: f32[1,1536], index: 6, kind: input, shape index: {}]   ;;  %s1507_s7 = inlined_call_operand.hbm [shape: f32[8,1536], index: 7, kind: output, shape index: {}]  }
   0x1   :  { %13 = vsyncpa [#allocation6], 0 }
   0x2   :  { %14 = vsyncpa [#allocation9], 0 }
   0x3   :  { %15 = vsyncpa [#allocation12], 0  ;;  %s33_s26 = sshll.u32 %s1501_s1, 4  ;;  %s34_s26 = int_to_ptr.hbm [resolvable:$true] %s33_s26 }
   0x4   :  { %16 = vsyncpa [#allocation4], 0  ;;  %s1382_s27 = smov [#allocation5]   ;;  %s54_s8 = sshll.u32 %s1503_s3, 4  ;;  %s55_s8 = int_to_ptr.hbm [resolvable:$true] %s54_s8 }
   0x5   :  { %s35_s28 = sshll.u32 %s1382_s27, 4  ;;  %s1383_s9 = smov [#allocation8]   ;;  %s36_s28 = int_to_ptr.vmem [resolvable:$true] %s35_s28 }
   0x6   :  { %38 = dma.hbm_to_vmem [thread:$0]  %s34_s26, 256, %s36_s28, [#allocation6]  }
   0x7   :  { %s56_s10 = sshll.u32 %s1383_s9, 4  ;;  %s1384_s11 = smov 256   ;;  %s57_s10 = int_to_ptr.vmem [resolvable:$true] %s56_s10 }
   0x8   :  { %s1385_s12 = smov 16   ;;  %s78_s1 = sshll.u32 %s1505_s5, 4  ;;  %s79_s1 = int_to_ptr.hbm [resolvable:$true] %s78_s1 }
   0x9   :  { %62 = dma.hbm_to_vmem [thread:$0]  %s55_s8, 6144, %s57_s10, [#allocation9], %s1384_s11, %s1384_s11, %s1385_s12  }
   0xa   :  { %s1386_s15 = smov [#allocation11]   ;;  %s22_s3 = sshll.u32 %s1500_s0, 4  ;;  %s23_s3 = int_to_ptr.hbm [resolvable:$true] %s22_s3 }
   0xb   :  { %s80_s16 = sshll.u32 %s1386_s15, 4  ;;  %s1387_s19 = smov 1536   ;;  %s81_s16 = int_to_ptr.vmem [resolvable:$true] %s80_s16 }
   0xc   :  { %s1388_s20 = smov 96   ;;  %s1389_s21 = smov [#allocation2]  }
   0xd   :  { %86 = dma.hbm_to_vmem [thread:$0]  %s79_s1, 36864, %s81_s16, [#allocation12], %s1387_s19, %s1387_s19, %s1388_s20  }
   0xe   :  { %s24_s22 = sshll.u32 %s1389_s21, 4  ;;  %s44_s25 = sshll.u32 %s1502_s2, 4  ;;  %s25_s22 = int_to_ptr.vmem [resolvable:$true] %s24_s22  ;;  %s45_s25 = int_to_ptr.hbm [resolvable:$true] %s44_s25 }
   0xf   :  { %27 = dma.hbm_to_vmem [thread:$0]  %s23_s3, 128, %s25_s22, [#allocation3]  }
  0x10   :  { %s68_s27 = sshll.u32 %s1504_s4, 4  ;;  %s1390_s28 = smov [#allocation7]   ;;  %s69_s27 = int_to_ptr.hbm [resolvable:$true] %s68_s27 }
  0x11   :  { %s46_s29 = sshll.u32 %s1390_s28, 4  ;;  %s1391_s0 = smov [#allocation10]   ;;  %s47_s29 = int_to_ptr.vmem [resolvable:$true] %s46_s29 }
  0x12   :  { %49 = dma.hbm_to_vmem [thread:$0]  %s45_s25, 32, %s47_s29, [#allocation6]  }
  0x13   :  { %s70_s30 = sshll.u32 %s1391_s0, 4  ;;  %s92_s10 = sshll.u32 %s1506_s6, 4  ;;  %s71_s30 = int_to_ptr.vmem [resolvable:$true] %s70_s30  ;;  %s93_s10 = int_to_ptr.hbm [resolvable:$true] %s92_s10 }
  0x14   :  { %73 = dma.hbm_to_vmem [thread:$0]  %s69_s27, 32, %s71_s30, [#allocation9]  }
  0x15   :  { %s1392_s2 = smov [#allocation13]  }
  0x16   :  { %s94_s11 = sshll.u32 %s1392_s2, 4  ;;  %s95_s11 = int_to_ptr.vmem [resolvable:$true] %s94_s11 }
  0x17   :  { %97 = dma.hbm_to_vmem [thread:$0]  %s93_s10, 192, %s95_s11, [#allocation12]  }
  0x18   :  { %1372 = dma.done.wait [#allocation3], 128  }
  0x19   :  { %1373 = vsyncadd [#allocation3], 4294967168 }
  0x1a   :  { %1374 = dma.done.wait [#allocation6], 288  }
  0x1b   :  { %1375 = vsyncadd [#allocation6], 4294967008 }
  0x1c   :  { %1376 = dma.done.wait [#allocation9], 6176  }
  0x1d   :  { %1377 = vsyncadd [#allocation9], 4294961120 }
  0x1e   :  { %1378 = dma.done.wait [#allocation12], 37056  }
  0x1f   :  { %1379 = vsyncadd [#allocation12], 4294930240  ;;  %vm135_vm0 = vcmask 64512   ;;  %v127_v0 = vld [vmem:[#allocation5] sm:$0xff]  ;;  %v126_v1 = vld [vmem:[#allocation2] sm:$0xff]  ;;  %vm235_vm1 = vcmask 523264  }
  0x20   :  { %v128_v2 = vld [vmem:[#allocation5 + $0x8] sm:$0xff]  ;;  %154 = vmatpush.msra.mxu3 %v127_v0  ;;  %v209_v5 = vld [vmem:[#allocation8 + $0xe0] sm:$0xff]  ;;  %v210_v6 = vld [vmem:[#allocation8 + $0xe8] sm:$0xff]  ;;  %s1393_s4 = smov [#allocation14]   ;;  %s1139_s14 = sshll.u32 %s1507_s7, 4  ;;  %s1140_s14 = int_to_ptr.hbm [resolvable:$true] %s1139_s14 }
  0x21   :  { %174 = vmatpush.msra.mxu1 %v128_v2  ;;  %v211_v3 = vld [vmem:[#allocation8 + $0xf0] sm:$0xff]  ;;  %v212_v4 = vld [vmem:[#allocation8 + $0xf8] sm:$0xff]  ;;  %1152 = vmatmul.msk.f32.vlgmr.msra.gmra.mxu3 %vm135_vm0, %v126_v1  ;;  %v205_v9 = vld [vmem:[#allocation8 + $0xc0] sm:$0xff]  ;;  %s1137_s6 = sshll.u32 %s1393_s4, 4  ;;  %s1138_s6 = int_to_ptr.vmem [resolvable:$true] %s1137_s6 }
  0x22   :  { %1153 = vmatmul.msk.f32.vlgmr.msra.gmra.mxu1 %vm135_vm0, %v126_v1  ;;  %239 = vmatpush.msra.mxu2 %v211_v3  ;;  %v207_v7 = vld [vmem:[#allocation8 + $0xd0] sm:$0xff]  ;;  %v208_v8 = vld [vmem:[#allocation8 + $0xd8] sm:$0xff]  ;;  %v206_v10 = vld [vmem:[#allocation8 + $0xc8] sm:$0xff] }
  0x23   :  { %279 = vmatpush.msra.mxu0 %v212_v4  ;;  %v203_v11 = vld [vmem:[#allocation8 + $0xb0] sm:$0xff]  ;;  %v204_v13 = vld [vmem:[#allocation8 + $0xb8] sm:$0xff]  ;;  %v225_v15 = vld [vmem:[#allocation8 + $0x160] sm:$0xff] }
  0x24   :  { %240 = vmatpush.msra.mxu2 %v209_v5  ;;  %v227_v12 = vld [vmem:[#allocation8 + $0x170] sm:$0xff]  ;;  %v228_v14 = vld [vmem:[#allocation8 + $0x178] sm:$0xff]  ;;  %v226_v16 = vld [vmem:[#allocation8 + $0x168] sm:$0xff] }
  0x25   :  { %280 = vmatpush.msra.mxu0 %v210_v6  ;;  %267 = vmatpush.msrb.mxu3 %v227_v12  ;;  %v201_v17 = vld [vmem:[#allocation8 + $0xa0] sm:$0xff]  ;;  %v202_v18 = vld [vmem:[#allocation8 + $0xa8] sm:$0xff]  ;;  %v223_v19 = vld [vmem:[#allocation8 + $0x150] sm:$0xff] }
  0x26   :  { %241 = vmatpush.msra.mxu2 %v207_v7  ;;  %307 = vmatpush.msrb.mxu1 %v228_v14  ;;  %v224_v20 = vld [vmem:[#allocation8 + $0x158] sm:$0xff]  ;;  %v221_v21 = vld [vmem:[#allocation8 + $0x140] sm:$0xff]  ;;  %v199_v22 = vld [vmem:[#allocation8 + $0x90] sm:$0xff] }
  0x27   :  { %281 = vmatpush.msra.mxu0 %v208_v8  ;;  %268 = vmatpush.msrb.mxu3 %v225_v15  ;;  %v200_v23 = vld [vmem:[#allocation8 + $0x98] sm:$0xff]  ;;  %v222_v24 = vld [vmem:[#allocation8 + $0x148] sm:$0xff]  ;;  %v197_v25 = vld [vmem:[#allocation8 + $0x80] sm:$0xff] }
  0x28   :  { %242 = vmatpush.msra.mxu2 %v205_v9  ;;  %308 = vmatpush.msrb.mxu1 %v226_v16  ;;  %v198_v26 = vld [vmem:[#allocation8 + $0x88] sm:$0xff]  ;;  %v195_v27 = vld [vmem:[#allocation8 + $0x70] sm:$0xff]  ;;  %v196_v28 = vld [vmem:[#allocation8 + $0x78] sm:$0xff] }
  0x29   :  { %282 = vmatpush.msra.mxu0 %v206_v10  ;;  %269 = vmatpush.msrb.mxu3 %v223_v19  ;;  %v193_v29 = vld [vmem:[#allocation8 + $0x60] sm:$0xff]  ;;  %v194_v30 = vld [vmem:[#allocation8 + $0x68] sm:$0xff]  ;;  %v191_v31 = vld [vmem:[#allocation8 + $0x50] sm:$0xff] }
  0x2a   :  { %243 = vmatpush.msra.mxu2 %v203_v11  ;;  %309 = vmatpush.msrb.mxu1 %v224_v20  ;;  %v192_v32 = vld [vmem:[#allocation8 + $0x58] sm:$0xff]  ;;  %v189_v33 = vld [vmem:[#allocation8 + $0x40] sm:$0xff]  ;;  %v190_v34 = vld [vmem:[#allocation8 + $0x48] sm:$0xff] }
  0x2b   :  { %283 = vmatpush.msra.mxu0 %v204_v13  ;;  %270 = vmatpush.msrb.mxu3 %v221_v21  ;;  %v187_v35 = vld [vmem:[#allocation8 + $0x30] sm:$0xff]  ;;  %v188_v36 = vld [vmem:[#allocation8 + $0x38] sm:$0xff]  ;;  %v185_v37 = vld [vmem:[#allocation8 + $0x20] sm:$0xff] }
  0x2c   :  { %244 = vmatpush.msra.mxu2 %v201_v17  ;;  %310 = vmatpush.msrb.mxu1 %v222_v24  ;;  %v219_v38 = vld [vmem:[#allocation8 + $0x130] sm:$0xff]  ;;  %v186_v39 = vld [vmem:[#allocation8 + $0x28] sm:$0xff]  ;;  %v220_v40 = vld [vmem:[#allocation8 + $0x138] sm:$0xff] }
  0x2d   :  { %284 = vmatpush.msra.mxu0 %v202_v18  ;;  %271 = vmatpush.msrb.mxu3 %v219_v38  ;;  %v183_v41 = vld [vmem:[#allocation8 + $0x10] sm:$0xff]  ;;  %v217_v42 = vld [vmem:[#allocation8 + $0x120] sm:$0xff]  ;;  %v184_v43 = vld [vmem:[#allocation8 + $0x18] sm:$0xff] }
  0x2e   :  { %245 = vmatpush.msra.mxu2 %v199_v22  ;;  %311 = vmatpush.msrb.mxu1 %v220_v40  ;;  %v218_v44 = vld [vmem:[#allocation8 + $0x128] sm:$0xff]  ;;  %v181_v45 = vld [vmem:[#allocation8] sm:$0xff]  ;;  %v215_v46 = vld [vmem:[#allocation8 + $0x110] sm:$0xff] }
  0x2f   :  { %285 = vmatpush.msra.mxu0 %v200_v23  ;;  %272 = vmatpush.msrb.mxu3 %v217_v42  ;;  %v182_v47 = vld [vmem:[#allocation8 + $0x8] sm:$0xff]  ;;  %v216_v48 = vld [vmem:[#allocation8 + $0x118] sm:$0xff]  ;;  %v213_v49 = vld [vmem:[#allocation8 + $0x100] sm:$0xff] }
  0x30   :  { %246 = vmatpush.msra.mxu2 %v197_v25  ;;  %312 = vmatpush.msrb.mxu1 %v218_v44  ;;  %v214_v50 = vld [vmem:[#allocation8 + $0x108] sm:$0xff]  ;;  %v129_v20 = vld [vmem:[#allocation7] sm:$0x3]  ;;  %v479_v40 = vld [vmem:[#allocation11 + $0x4f0] sm:$0xff] }
  0x31   :  { %286 = vmatpush.msra.mxu0 %v198_v26  ;;  %273 = vmatpush.msrb.mxu3 %v215_v46  ;;  %v597_v51 = vld [vmem:[#allocation11 + $0x8a0] sm:$0xff]  ;;  %v598_v52 = vld [vmem:[#allocation11 + $0x8a8] sm:$0xff]  ;;  %v132_v22 = vperm.slane %v129_v20, 1  ;;  %v467_v44 = vld [vmem:[#allocation11 + $0x490] sm:$0xff] }
  0x32   :  { %247 = vmatpush.msra.mxu2 %v195_v27  ;;  %313 = vmatpush.msrb.mxu1 %v216_v48  ;;  %v586_v53 = vld [vmem:[#allocation11 + $0x848] sm:$0xff]  ;;  %v585_v54 = vld [vmem:[#allocation11 + $0x840] sm:$0xff]  ;;  %v455_v48 = vld [vmem:[#allocation11 + $0x430] sm:$0xff] }
  0x33   :  { %287 = vmatpush.msra.mxu0 %v196_v28  ;;  %274 = vmatpush.msrb.mxu3 %v213_v49  ;;  %v501_v55 = vld [vmem:[#allocation11 + $0x5a0] sm:$0xff]  ;;  %v574_v56 = vld [vmem:[#allocation11 + $0x7e8] sm:$0xff] }
  0x34   :  { %248 = vmatpush.msra.mxu2 %v193_v29  ;;  %314 = vmatpush.msrb.mxu1 %v214_v50  ;;  %v502_v57 = vld [vmem:[#allocation11 + $0x5a8] sm:$0xff]  ;;  %v573_v58 = vld [vmem:[#allocation11 + $0x7e0] sm:$0xff] }
  0x35   :  { %288 = vmatpush.msra.mxu0 %v194_v30  ;;  %640 = vmatpush.msra.mxu3 %v501_v55  ;;  %v489_v59 = vld [vmem:[#allocation11 + $0x540] sm:$0xff]  ;;  %v490_v60 = vld [vmem:[#allocation11 + $0x548] sm:$0xff]  ;;  %v131_v30 = vperm.slane %v129_v20, 0  ;;  %v468_v55 = vld [vmem:[#allocation11 + $0x498] sm:$0xff] }
  0x36   :  { %249 = vmatpush.msra.mxu2 %v191_v31  ;;  %668 = vmatpush.msra.mxu1 %v597_v51  ;;  %v562_v61 = vld [vmem:[#allocation11 + $0x788] sm:$0xff]  ;;  %v477_v62 = vld [vmem:[#allocation11 + $0x4e0] sm:$0xff]  ;;  %v480_v51 = vld [vmem:[#allocation11 + $0x4f8] sm:$0xff] }
  0x37   :  { %289 = vmatpush.msra.mxu0 %v192_v32  ;;  %641 = vmatpush.msra.mxu3 %v489_v59  ;;  %v561_v63 = vld [vmem:[#allocation11 + $0x780] sm:$0xff]  ;;  %v478_v0 = vld [vmem:[#allocation11 + $0x4e8] sm:$0xff]  ;;  %v503_v32 = vld [vmem:[#allocation11 + $0x5b0] sm:$0xff] }
  0x38   :  { %250 = vmatpush.msra.mxu2 %v189_v33  ;;  %669 = vmatpush.msra.mxu1 %v585_v54  ;;  %v465_v1 = vld [vmem:[#allocation11 + $0x480] sm:$0xff]  ;;  %v550_v2 = vld [vmem:[#allocation11 + $0x728] sm:$0xff]  ;;  %v600_v54 = vld [vmem:[#allocation11 + $0x8b8] sm:$0xff] }
  0x39   :  { %290 = vmatpush.msra.mxu0 %v190_v34  ;;  %642 = vmatpush.msra.mxu3 %v477_v62  ;;  %v466_v3 = vld [vmem:[#allocation11 + $0x488] sm:$0xff]  ;;  %v549_v4 = vld [vmem:[#allocation11 + $0x720] sm:$0xff]  ;;  %v444_v59 = vld [vmem:[#allocation11 + $0x3d8] sm:$0xff] }
  0x3a   :  { %251 = vmatpush.msra.mxu2 %v187_v35  ;;  %670 = vmatpush.msra.mxu1 %v573_v58  ;;  %v453_v5 = vld [vmem:[#allocation11 + $0x420] sm:$0xff]  ;;  %v538_v6 = vld [vmem:[#allocation11 + $0x6c8] sm:$0xff]  ;;  %v491_v35 = vld [vmem:[#allocation11 + $0x550] sm:$0xff] }
  0x3b   :  { %291 = vmatpush.msra.mxu0 %v188_v36  ;;  %643 = vmatpush.msra.mxu3 %v465_v1  ;;  %v454_v7 = vld [vmem:[#allocation11 + $0x428] sm:$0xff]  ;;  %v537_v8 = vld [vmem:[#allocation11 + $0x6c0] sm:$0xff]  ;;  %v419_v58 = vld [vmem:[#allocation11 + $0x310] sm:$0xff] }
  0x3c   :  { %252 = vmatpush.msra.mxu2 %v185_v37  ;;  %671 = vmatpush.msra.mxu1 %v561_v63  ;;  %v441_v9 = vld [vmem:[#allocation11 + $0x3c0] sm:$0xff]  ;;  %v526_v10 = vld [vmem:[#allocation11 + $0x668] sm:$0xff]  ;;  %v395_v62 = vld [vmem:[#allocation11 + $0x250] sm:$0xff] }
  0x3d   :  { %292 = vmatpush.msra.mxu0 %v186_v39  ;;  %644 = vmatpush.msra.mxu3 %v453_v5  ;;  %v442_v11 = vld [vmem:[#allocation11 + $0x3c8] sm:$0xff]  ;;  %v525_v12 = vld [vmem:[#allocation11 + $0x660] sm:$0xff]  ;;  %v420_v63 = vld [vmem:[#allocation11 + $0x318] sm:$0xff] }
  0x3e   :  { %253 = vmatpush.msra.mxu2 %v183_v41  ;;  %672 = vmatpush.msra.mxu1 %v549_v4  ;;  %v429_v13 = vld [vmem:[#allocation11 + $0x360] sm:$0xff]  ;;  %v514_v14 = vld [vmem:[#allocation11 + $0x608] sm:$0xff]  ;;  %v408_v1 = vld [vmem:[#allocation11 + $0x2b8] sm:$0xff] }
  0x3f   :  { %293 = vmatpush.msra.mxu0 %v184_v43  ;;  %645 = vmatpush.msra.mxu3 %v441_v9  ;;  %v430_v15 = vld [vmem:[#allocation11 + $0x368] sm:$0xff]  ;;  %v513_v16 = vld [vmem:[#allocation11 + $0x600] sm:$0xff]  ;;  %v504_v43 = vld [vmem:[#allocation11 + $0x5b8] sm:$0xff] }
  0x40   :  { %254 = vmatpush.msra.mxu2 %v181_v45  ;;  %673 = vmatpush.msra.mxu1 %v537_v8  ;;  %v417_v17 = vld [vmem:[#allocation11 + $0x300] sm:$0xff]  ;;  %v418_v18 = vld [vmem:[#allocation11 + $0x308] sm:$0xff]  ;;  %v384_v4 = vld [vmem:[#allocation11 + $0x1f8] sm:$0xff] }
  0x41   :  { %294 = vmatpush.msra.mxu0 %v182_v47  ;;  %646 = vmatpush.msra.mxu3 %v429_v13  ;;  %v405_v19 = vld [vmem:[#allocation11 + $0x2a0] sm:$0xff]  ;;  %v406_v21 = vld [vmem:[#allocation11 + $0x2a8] sm:$0xff]  ;;  %v492_v47 = vld [vmem:[#allocation11 + $0x558] sm:$0xff] }
  0x42   :  { %680 = vmatpush.msrb.mxu2 %v502_v57  ;;  %674 = vmatpush.msra.mxu1 %v525_v12  ;;  %v393_v23 = vld [vmem:[#allocation11 + $0x240] sm:$0xff]  ;;  %v394_v24 = vld [vmem:[#allocation11 + $0x248] sm:$0xff]  ;;  %v456_v57 = vld [vmem:[#allocation11 + $0x438] sm:$0xff] }
  0x43   :  { %708 = vmatpush.msrb.mxu0 %v598_v52  ;;  %647 = vmatpush.msra.mxu3 %v417_v17  ;;  %v381_v25 = vld [vmem:[#allocation11 + $0x1e0] sm:$0xff]  ;;  %v382_v27 = vld [vmem:[#allocation11 + $0x1e8] sm:$0xff]  ;;  %v443_v52 = vld [vmem:[#allocation11 + $0x3d0] sm:$0xff] }
  0x44   :  { %681 = vmatpush.msrb.mxu2 %v490_v60  ;;  %675 = vmatpush.msra.mxu1 %v513_v16  ;;  %v369_v29 = vld [vmem:[#allocation11 + $0x180] sm:$0xff]  ;;  %v370_v33 = vld [vmem:[#allocation11 + $0x188] sm:$0xff]  ;;  %v407_v60 = vld [vmem:[#allocation11 + $0x2b0] sm:$0xff] }
  0x45   :  { %709 = vmatpush.msrb.mxu0 %v586_v53  ;;  %648 = vmatpush.msra.mxu3 %v405_v19  ;;  %v357_v34 = vld [vmem:[#allocation11 + $0x120] sm:$0xff]  ;;  %v358_v36 = vld [vmem:[#allocation11 + $0x128] sm:$0xff]  ;;  %v599_v53 = vld [vmem:[#allocation11 + $0x8b0] sm:$0xff] }
  0x46   :  { %682 = vmatpush.msrb.mxu2 %v478_v0  ;;  %v345_v38 = vld [vmem:[#allocation11 + $0xc0] sm:$0xff]  ;;  %v346_v41 = vld [vmem:[#allocation11 + $0xc8] sm:$0xff]  ;;  %v383_v0 = vld [vmem:[#allocation11 + $0x1f0] sm:$0xff] }
  0x47   :  { %710 = vmatpush.msrb.mxu0 %v574_v56  ;;  %649 = vmatpush.msra.mxu3 %v393_v23  ;;  %v333_v45 = vld [vmem:[#allocation11 + $0x60] sm:$0xff]  ;;  %v334_v46 = vld [vmem:[#allocation11 + $0x68] sm:$0xff]  ;;  %v431_v56 = vld [vmem:[#allocation11 + $0x370] sm:$0xff] }
  0x48   :  { %683 = vmatpush.msrb.mxu2 %v466_v3  ;;  %v321_v49 = vld [vmem:[#allocation11] sm:$0xff]  ;;  %v322_v50 = vld [vmem:[#allocation11 + $0x8] sm:$0xff]  ;;  %v396_v3 = vld [vmem:[#allocation11 + $0x258] sm:$0xff] }
  0x49   :  { %711 = vmatpush.msrb.mxu0 %v562_v61  ;;  %650 = vmatpush.msra.mxu3 %v381_v25  ;;  %v432_v61 = vld [vmem:[#allocation11 + $0x378] sm:$0xff]  ;;  %v551_v19 = vld [vmem:[#allocation11 + $0x730] sm:$0xff] }
  0x4a   :  { %684 = vmatpush.msrb.mxu2 %v454_v7  ;;  %v372_v5 = vld [vmem:[#allocation11 + $0x198] sm:$0xff]  ;;  %v587_v7 = vld [vmem:[#allocation11 + $0x850] sm:$0xff] }
  0x4b   :  { %712 = vmatpush.msrb.mxu0 %v550_v2  ;;  %651 = vmatpush.msra.mxu3 %v369_v29  ;;  %v371_v2 = vld [vmem:[#allocation11 + $0x190] sm:$0xff]  ;;  %v360_v8 = vld [vmem:[#allocation11 + $0x138] sm:$0xff] }
  0x4c   :  { %685 = vmatpush.msrb.mxu2 %v442_v11  ;;  %v588_v9 = vld [vmem:[#allocation11 + $0x858] sm:$0xff]  ;;  %v575_v11 = vld [vmem:[#allocation11 + $0x7f0] sm:$0xff] }
  0x4d   :  { %713 = vmatpush.msrb.mxu0 %v538_v6  ;;  %652 = vmatpush.msra.mxu3 %v357_v34  ;;  %v359_v6 = vld [vmem:[#allocation11 + $0x130] sm:$0xff]  ;;  %v348_v12 = vld [vmem:[#allocation11 + $0xd8] sm:$0xff] }
  0x4e   :  { %686 = vmatpush.msrb.mxu2 %v430_v15  ;;  %v576_v13 = vld [vmem:[#allocation11 + $0x7f8] sm:$0xff]  ;;  %v563_v15 = vld [vmem:[#allocation11 + $0x790] sm:$0xff] }
  0x4f   :  { %714 = vmatpush.msrb.mxu0 %v526_v10  ;;  %653 = vmatpush.msra.mxu3 %v345_v38  ;;  %v347_v10 = vld [vmem:[#allocation11 + $0xd0] sm:$0xff]  ;;  %v336_v16 = vld [vmem:[#allocation11 + $0x78] sm:$0xff] }
  0x50   :  { %687 = vmatpush.msrb.mxu2 %v418_v18  ;;  %v564_v17 = vld [vmem:[#allocation11 + $0x798] sm:$0xff]  ;;  %v323_v18 = vld [vmem:[#allocation11 + $0x10] sm:$0xff] }
  0x51   :  { %715 = vmatpush.msrb.mxu0 %v514_v14  ;;  %654 = vmatpush.msra.mxu3 %v333_v45  ;;  %v335_v14 = vld [vmem:[#allocation11 + $0x70] sm:$0xff]  ;;  %v324_v20 = vld [vmem:[#allocation11 + $0x18] sm:$0xff]  ;;  %v578_v45 = vld [vmem:[#allocation11 + $0x808] sm:$0xff] }
  0x52   :  { %688 = vmatpush.msrb.mxu2 %v406_v21  ;;  %v552_v21 = vld [vmem:[#allocation11 + $0x738] sm:$0xff] }
  0x53   :  { %655 = vmatpush.msra.mxu3 %v321_v49  ;;  %v540_v23 = vld [vmem:[#allocation11 + $0x6d8] sm:$0xff]  ;;  %v506_v49 = vld [vmem:[#allocation11 + $0x5c8] sm:$0xff] }
  0x54   :  { %689 = vmatpush.msrb.mxu2 %v394_v24  ;;  %v527_v24 = vld [vmem:[#allocation11 + $0x670] sm:$0xff]  ;;  %v528_v25 = vld [vmem:[#allocation11 + $0x678] sm:$0xff] }
  0x56   :  { %690 = vmatpush.msrb.mxu2 %v382_v27  ;;  %v516_v27 = vld [vmem:[#allocation11 + $0x618] sm:$0xff] }
  0x58   :  { %691 = vmatpush.msrb.mxu2 %v370_v33 }
  0x5a   :  { %692 = vmatpush.msrb.mxu2 %v358_v36  ;;  %v601_v36 = vld [vmem:[#allocation11 + $0x8c0] sm:$0xff] }
  0x5c   :  { %693 = vmatpush.msrb.mxu2 %v346_v41  ;;  %v589_v41 = vld [vmem:[#allocation11 + $0x860] sm:$0xff] }
  0x5e   :  { %694 = vmatpush.msrb.mxu2 %v334_v46 }
  0x60   :  { %695 = vmatpush.msrb.mxu2 %v322_v50  ;;  %v566_v50 = vld [vmem:[#allocation11 + $0x7a8] sm:$0xff] }
  0x9f   :  { %v176_v26 = vpop.f32.mrf.mxu1 }
  0xa0   :  { %v177_v28 = vadd.f32 %v176_v26, %v132_v22  ;;  %v539_v22 = vld [vmem:[#allocation11 + $0x6d0] sm:$0xff] }
  0xa1   :  { %v515_v26 = vld [vmem:[#allocation11 + $0x610] sm:$0xff] }
  0xa2   :  { %v180_v31 = vmax.f32 %v177_v28, 0.0  ;;  %v229_v28 = vld [vmem:[#allocation10] sm:$0x3] }
  0xa3   :  { %v232_v29 = vperm.slane %v229_v28, 1  ;;  %v231_v34 = vperm.slane %v229_v28, 0  ;;  %v436_v28 = vld [vmem:[#allocation11 + $0x398] sm:$0xff] }
  0xa4   :  { %1154 = vmatmul.msk.f32.vlgmr.msrb.gmra.mxu3 %vm235_vm1, %v180_v31  ;;  %1155 = vmatmul.msk.f32.vlgmr.msrb.gmra.mxu1 %vm235_vm1, %v180_v31  ;;  %v156_v37 = vpop.f32.mrf.mxu3 }
  0xa5   :  { %720 = vmatpush.msrb.mxu1 %v503_v32  ;;  %v157_v39 = vadd.f32 %v156_v37, %v131_v30  ;;  %748 = vmatpush.msrb.mxu3 %v599_v53  ;;  %v602_v37 = vld [vmem:[#allocation11 + $0x8c8] sm:$0xff] }
  0xa6   :  { %v494_v53 = vld [vmem:[#allocation11 + $0x568] sm:$0xff] }
  0xa7   :  { %721 = vmatpush.msrb.mxu1 %v491_v35  ;;  %v179_v42 = vmax.f32 %v157_v39, 0.0  ;;  %749 = vmatpush.msrb.mxu3 %v587_v7  ;;  %v495_v7 = vld [vmem:[#allocation11 + $0x570] sm:$0xff] }
  0xa9   :  { %722 = vmatpush.msrb.mxu1 %v479_v40  ;;  %255 = vmatmul.f32.vlgmr.msra.gmra.mxu2 %v179_v42 }
  0xaa   :  { %295 = vmatmul.f32.vlgmr.msra.gmra.mxu0 %v179_v42  ;;  %788 = vmatpush.msra.mxu2 %v600_v54  ;;  %v590_v42 = vld [vmem:[#allocation11 + $0x868] sm:$0xff] }
  0xab   :  { %760 = vmatpush.msra.mxu0 %v504_v43  ;;  %723 = vmatpush.msrb.mxu1 %v467_v44  ;;  %v577_v44 = vld [vmem:[#allocation11 + $0x800] sm:$0xff]  ;;  %v554_v54 = vld [vmem:[#allocation11 + $0x748] sm:$0xff] }
  0xac   :  { %789 = vmatpush.msra.mxu2 %v588_v9  ;;  %750 = vmatpush.msrb.mxu3 %v575_v11  ;;  %v433_v9 = vld [vmem:[#allocation11 + $0x380] sm:$0xff]  ;;  %v483_v11 = vld [vmem:[#allocation11 + $0x510] sm:$0xff] }
  0xad   :  { %761 = vmatpush.msra.mxu0 %v492_v47  ;;  %724 = vmatpush.msrb.mxu1 %v455_v48  ;;  %v505_v47 = vld [vmem:[#allocation11 + $0x5c0] sm:$0xff] }
  0xae   :  { %790 = vmatpush.msra.mxu2 %v576_v13  ;;  %751 = vmatpush.msrb.mxu3 %v563_v15  ;;  %v565_v48 = vld [vmem:[#allocation11 + $0x7a0] sm:$0xff]  ;;  %v471_v15 = vld [vmem:[#allocation11 + $0x4b0] sm:$0xff] }
  0xaf   :  { %762 = vmatpush.msra.mxu0 %v480_v51  ;;  %725 = vmatpush.msrb.mxu1 %v443_v52  ;;  %v493_v51 = vld [vmem:[#allocation11 + $0x560] sm:$0xff] }
  0xb0   :  { %791 = vmatpush.msra.mxu2 %v564_v17  ;;  %752 = vmatpush.msrb.mxu3 %v551_v19  ;;  %v553_v52 = vld [vmem:[#allocation11 + $0x740] sm:$0xff]  ;;  %v459_v19 = vld [vmem:[#allocation11 + $0x450] sm:$0xff] }
  0xb1   :  { %763 = vmatpush.msra.mxu0 %v468_v55  ;;  %726 = vmatpush.msrb.mxu1 %v431_v56  ;;  %v481_v55 = vld [vmem:[#allocation11 + $0x500] sm:$0xff] }
  0xb2   :  { %792 = vmatpush.msra.mxu2 %v552_v21  ;;  %753 = vmatpush.msrb.mxu3 %v539_v22  ;;  %v541_v56 = vld [vmem:[#allocation11 + $0x6e0] sm:$0xff]  ;;  %v398_v22 = vld [vmem:[#allocation11 + $0x268] sm:$0xff] }
  0xb3   :  { %764 = vmatpush.msra.mxu0 %v456_v57  ;;  %727 = vmatpush.msrb.mxu1 %v419_v58  ;;  %v482_v57 = vld [vmem:[#allocation11 + $0x508] sm:$0xff]  ;;  %v421_v13 = vld [vmem:[#allocation11 + $0x320] sm:$0xff] }
  0xb4   :  { %793 = vmatpush.msra.mxu2 %v540_v23  ;;  %754 = vmatpush.msrb.mxu3 %v527_v24  ;;  %v542_v58 = vld [vmem:[#allocation11 + $0x6e8] sm:$0xff]  ;;  %v409_v17 = vld [vmem:[#allocation11 + $0x2c0] sm:$0xff]  ;;  %v447_v23 = vld [vmem:[#allocation11 + $0x3f0] sm:$0xff] }
  0xb5   :  { %765 = vmatpush.msra.mxu0 %v444_v59  ;;  %728 = vmatpush.msrb.mxu1 %v407_v60  ;;  %v469_v59 = vld [vmem:[#allocation11 + $0x4a0] sm:$0xff]  ;;  %v448_v24 = vld [vmem:[#allocation11 + $0x3f8] sm:$0xff] }
  0xb6   :  { %794 = vmatpush.msra.mxu2 %v528_v25  ;;  %755 = vmatpush.msrb.mxu3 %v515_v26  ;;  %v529_v60 = vld [vmem:[#allocation11 + $0x680] sm:$0xff]  ;;  %v386_v26 = vld [vmem:[#allocation11 + $0x208] sm:$0xff] }
  0xb7   :  { %766 = vmatpush.msra.mxu0 %v432_v61  ;;  %729 = vmatpush.msrb.mxu1 %v395_v62  ;;  %v470_v61 = vld [vmem:[#allocation11 + $0x4a8] sm:$0xff]  ;;  %v397_v21 = vld [vmem:[#allocation11 + $0x260] sm:$0xff] }
  0xb8   :  { %795 = vmatpush.msra.mxu2 %v516_v27  ;;  %v530_v62 = vld [vmem:[#allocation11 + $0x688] sm:$0xff]  ;;  %v385_v25 = vld [vmem:[#allocation11 + $0x200] sm:$0xff]  ;;  %v435_v27 = vld [vmem:[#allocation11 + $0x390] sm:$0xff] }
  0xb9   :  { %767 = vmatpush.msra.mxu0 %v420_v63  ;;  %730 = vmatpush.msrb.mxu1 %v383_v0  ;;  %v457_v63 = vld [vmem:[#allocation11 + $0x440] sm:$0xff] }
  0xba   :  { %v517_v0 = vld [vmem:[#allocation11 + $0x620] sm:$0xff] }
  0xbb   :  { %768 = vmatpush.msra.mxu0 %v408_v1  ;;  %731 = vmatpush.msrb.mxu1 %v371_v2  ;;  %v458_v1 = vld [vmem:[#allocation11 + $0x448] sm:$0xff] }
  0xbc   :  { %v518_v2 = vld [vmem:[#allocation11 + $0x628] sm:$0xff] }
  0xbd   :  { %769 = vmatpush.msra.mxu0 %v396_v3  ;;  %732 = vmatpush.msrb.mxu1 %v359_v6  ;;  %v507_v3 = vld [vmem:[#allocation11 + $0x5d0] sm:$0xff]  ;;  %v446_v6 = vld [vmem:[#allocation11 + $0x3e8] sm:$0xff] }
  0xbf   :  { %770 = vmatpush.msra.mxu0 %v384_v4  ;;  %733 = vmatpush.msrb.mxu1 %v347_v10  ;;  %v508_v4 = vld [vmem:[#allocation11 + $0x5d8] sm:$0xff]  ;;  %v434_v10 = vld [vmem:[#allocation11 + $0x388] sm:$0xff] }
  0xc1   :  { %771 = vmatpush.msra.mxu0 %v372_v5  ;;  %734 = vmatpush.msrb.mxu1 %v335_v14  ;;  %v445_v5 = vld [vmem:[#allocation11 + $0x3e0] sm:$0xff]  ;;  %v422_v14 = vld [vmem:[#allocation11 + $0x328] sm:$0xff] }
  0xc3   :  { %772 = vmatpush.msra.mxu0 %v360_v8  ;;  %735 = vmatpush.msrb.mxu1 %v323_v18  ;;  %v496_v8 = vld [vmem:[#allocation11 + $0x578] sm:$0xff]  ;;  %v410_v18 = vld [vmem:[#allocation11 + $0x2c8] sm:$0xff] }
  0xc5   :  { %773 = vmatpush.msra.mxu0 %v348_v12  ;;  %v484_v12 = vld [vmem:[#allocation11 + $0x518] sm:$0xff] }
  0xc7   :  { %774 = vmatpush.msra.mxu0 %v336_v16  ;;  %v472_v16 = vld [vmem:[#allocation11 + $0x4b8] sm:$0xff] }
  0xc9   :  { %775 = vmatpush.msra.mxu0 %v324_v20  ;;  %v460_v20 = vld [vmem:[#allocation11 + $0x458] sm:$0xff] }
 0x121   :  { %v316_v31 = vpop.f32.mrf.mxu1 }
 0x127   :  { %v296_v30 = vpop.f32.mrf.mxu0  ;;  %v276_v39 = vpop.f32.mrf.mxu3 }
 0x128   :  { %v297_v32 = vadd.f32 %v296_v30, %v232_v29  ;;  %v373_v29 = vld [vmem:[#allocation11 + $0x1a0] sm:$0xff]  ;;  %v374_v30 = vld [vmem:[#allocation11 + $0x1a8] sm:$0xff] }
 0x12a   :  { %v317_v33 = vadd.f32 %v316_v31, %v297_v32  ;;  %v423_v31 = vld [vmem:[#allocation11 + $0x330] sm:$0xff]  ;;  %v424_v32 = vld [vmem:[#allocation11 + $0x338] sm:$0xff] }
 0x12c   :  { %v1457_v35 = vmax.f32 %v317_v33, 0.0  ;;  %v256_v38 = vpop.f32.mrf.mxu2  ;;  %v361_v33 = vld [vmem:[#allocation11 + $0x140] sm:$0xff] }
 0x12d   :  { %v257_v40 = vadd.f32 %v256_v38, %v231_v34  ;;  %v362_v34 = vld [vmem:[#allocation11 + $0x148] sm:$0xff]  ;;  %v349_v38 = vld [vmem:[#allocation11 + $0xe0] sm:$0xff] }
 0x12e   :  { %1156 = vmatmul.msk.f32.vlgmr.msra.gmra.mxu1 %vm235_vm1, %v1457_v35  ;;  %1157 = vmatmul.msk.f32.vlgmr.msrb.gmra.mxu0 %vm235_vm1, %v1457_v35 }
 0x12f   :  { %828 = vmatpush.msra.mxu1 %v601_v36  ;;  %868 = vmatpush.msrb.mxu0 %v602_v37  ;;  %v277_v43 = vadd.f32 %v276_v39, %v257_v40  ;;  %v411_v36 = vld [vmem:[#allocation11 + $0x2d0] sm:$0xff]  ;;  %v412_v37 = vld [vmem:[#allocation11 + $0x2d8] sm:$0xff]  ;;  %v350_v39 = vld [vmem:[#allocation11 + $0xe8] sm:$0xff] }
 0x130   :  { %v399_v40 = vld [vmem:[#allocation11 + $0x270] sm:$0xff] }
 0x131   :  { %829 = vmatpush.msra.mxu1 %v589_v41  ;;  %869 = vmatpush.msrb.mxu0 %v590_v42  ;;  %v1463_v46 = vmax.f32 %v277_v43, 0.0  ;;  %v400_v41 = vld [vmem:[#allocation11 + $0x278] sm:$0xff]  ;;  %v337_v42 = vld [vmem:[#allocation11 + $0x80] sm:$0xff]  ;;  %v338_v43 = vld [vmem:[#allocation11 + $0x88] sm:$0xff] }
 0x133   :  { %830 = vmatpush.msra.mxu1 %v577_v44  ;;  %870 = vmatpush.msrb.mxu0 %v578_v45  ;;  %v387_v44 = vld [vmem:[#allocation11 + $0x210] sm:$0xff]  ;;  %v388_v45 = vld [vmem:[#allocation11 + $0x218] sm:$0xff] }
 0x134   :  { %656 = vmatmul.f32.vlgmr.msra.gmra.mxu3 %v1463_v46  ;;  %696 = vmatmul.f32.vlgmr.msrb.gmra.mxu2 %v1463_v46 }
 0x135   :  { %800 = vmatpush.msra.mxu3 %v505_v47  ;;  %831 = vmatpush.msra.mxu1 %v565_v48  ;;  %v325_v47 = vld [vmem:[#allocation11 + $0x20] sm:$0xff]  ;;  %v326_v48 = vld [vmem:[#allocation11 + $0x28] sm:$0xff] }
 0x136   :  { %840 = vmatpush.msrb.mxu2 %v506_v49  ;;  %871 = vmatpush.msrb.mxu0 %v566_v50  ;;  %v375_v49 = vld [vmem:[#allocation11 + $0x1b0] sm:$0xff] }
 0x137   :  { %736 = vmatmul.f32.vlgmr.msrb.gmra.mxu1 %v1463_v46  ;;  %776 = vmatmul.f32.vlgmr.msra.gmra.mxu0 %v1463_v46  ;;  %v603_v50 = vld [vmem:[#allocation11 + $0x8d0] sm:$0xff] }
 0x138   :  { %801 = vmatpush.msra.mxu3 %v493_v51  ;;  %832 = vmatpush.msra.mxu1 %v553_v52  ;;  %v376_v51 = vld [vmem:[#allocation11 + $0x1b8] sm:$0xff] }
 0x139   :  { %841 = vmatpush.msrb.mxu2 %v494_v53  ;;  %872 = vmatpush.msrb.mxu0 %v554_v54  ;;  %v604_v52 = vld [vmem:[#allocation11 + $0x8d8] sm:$0xff]  ;;  %v363_v53 = vld [vmem:[#allocation11 + $0x150] sm:$0xff] }
 0x13a   :  { %802 = vmatpush.msra.mxu3 %v481_v55  ;;  %833 = vmatpush.msra.mxu1 %v541_v56  ;;  %v591_v54 = vld [vmem:[#allocation11 + $0x870] sm:$0xff]  ;;  %v364_v55 = vld [vmem:[#allocation11 + $0x158] sm:$0xff] }
 0x13b   :  { %842 = vmatpush.msrb.mxu2 %v482_v57  ;;  %873 = vmatpush.msrb.mxu0 %v542_v58  ;;  %v592_v56 = vld [vmem:[#allocation11 + $0x878] sm:$0xff]  ;;  %v351_v57 = vld [vmem:[#allocation11 + $0xf0] sm:$0xff] }
 0x13c   :  { %803 = vmatpush.msra.mxu3 %v469_v59  ;;  %834 = vmatpush.msra.mxu1 %v529_v60  ;;  %v579_v58 = vld [vmem:[#allocation11 + $0x810] sm:$0xff]  ;;  %v352_v59 = vld [vmem:[#allocation11 + $0xf8] sm:$0xff] }
 0x13d   :  { %843 = vmatpush.msrb.mxu2 %v470_v61  ;;  %874 = vmatpush.msrb.mxu0 %v530_v62  ;;  %v580_v60 = vld [vmem:[#allocation11 + $0x818] sm:$0xff]  ;;  %v339_v61 = vld [vmem:[#allocation11 + $0x90] sm:$0xff] }
 0x13e   :  { %1158 = vmatmul.msk.f32.vlgmr.msrb.gmra.mxu3 %vm235_vm1, %v1457_v35  ;;  %1159 = vmatmul.msk.f32.vlgmr.msra.gmra.mxu2 %vm235_vm1, %v1457_v35  ;;  %v567_v62 = vld [vmem:[#allocation11 + $0x7b0] sm:$0xff] }
 0x13f   :  { %804 = vmatpush.msra.mxu3 %v457_v63  ;;  %835 = vmatpush.msra.mxu1 %v517_v0  ;;  %v340_v63 = vld [vmem:[#allocation11 + $0x98] sm:$0xff] }
 0x140   :  { %844 = vmatpush.msrb.mxu2 %v458_v1  ;;  %875 = vmatpush.msrb.mxu0 %v518_v2  ;;  %v568_v0 = vld [vmem:[#allocation11 + $0x7b8] sm:$0xff]  ;;  %v327_v1 = vld [vmem:[#allocation11 + $0x30] sm:$0xff] }
 0x141   :  { %880 = vmatpush.msrb.mxu1 %v507_v3  ;;  %805 = vmatpush.msra.mxu3 %v445_v5  ;;  %v555_v2 = vld [vmem:[#allocation11 + $0x750] sm:$0xff]  ;;  %v328_v3 = vld [vmem:[#allocation11 + $0x38] sm:$0xff]  ;;  %v605_v5 = vld [vmem:[#allocation11 + $0x8e0] sm:$0xff] }
 0x142   :  { %920 = vmatpush.msra.mxu0 %v508_v4  ;;  %1160 = vmatmul.msk.f32.vlgmr.msra.gmra.mxu1 %vm235_vm1, %v1457_v35  ;;  %v556_v4 = vld [vmem:[#allocation11 + $0x758] sm:$0xff] }
 0x143   :  { %845 = vmatpush.msrb.mxu2 %v446_v6  ;;  %1161 = vmatmul.msk.f32.vlgmr.msrb.gmra.mxu0 %vm235_vm1, %v1457_v35  ;;  %v606_v6 = vld [vmem:[#allocation11 + $0x8e8] sm:$0xff] }
 0x144   :  { %881 = vmatpush.msrb.mxu1 %v495_v7  ;;  %921 = vmatpush.msra.mxu0 %v496_v8  ;;  %v543_v7 = vld [vmem:[#allocation11 + $0x6f0] sm:$0xff]  ;;  %v544_v8 = vld [vmem:[#allocation11 + $0x6f8] sm:$0xff] }
 0x145   :  { %806 = vmatpush.msra.mxu3 %v433_v9  ;;  %846 = vmatpush.msrb.mxu2 %v434_v10  ;;  %v593_v9 = vld [vmem:[#allocation11 + $0x880] sm:$0xff]  ;;  %v594_v10 = vld [vmem:[#allocation11 + $0x888] sm:$0xff] }
 0x146   :  { %882 = vmatpush.msrb.mxu1 %v483_v11  ;;  %922 = vmatpush.msra.mxu0 %v484_v12  ;;  %v531_v11 = vld [vmem:[#allocation11 + $0x690] sm:$0xff]  ;;  %v532_v12 = vld [vmem:[#allocation11 + $0x698] sm:$0xff] }
 0x147   :  { %807 = vmatpush.msra.mxu3 %v421_v13  ;;  %847 = vmatpush.msrb.mxu2 %v422_v14  ;;  %v581_v13 = vld [vmem:[#allocation11 + $0x820] sm:$0xff]  ;;  %v582_v14 = vld [vmem:[#allocation11 + $0x828] sm:$0xff] }
 0x148   :  { %883 = vmatpush.msrb.mxu1 %v471_v15  ;;  %923 = vmatpush.msra.mxu0 %v472_v16  ;;  %v519_v15 = vld [vmem:[#allocation11 + $0x630] sm:$0xff]  ;;  %v520_v16 = vld [vmem:[#allocation11 + $0x638] sm:$0xff] }
 0x149   :  { %808 = vmatpush.msra.mxu3 %v409_v17  ;;  %848 = vmatpush.msrb.mxu2 %v410_v18  ;;  %v509_v17 = vld [vmem:[#allocation11 + $0x5e0] sm:$0xff] }
 0x14a   :  { %884 = vmatpush.msrb.mxu1 %v459_v19  ;;  %924 = vmatpush.msra.mxu0 %v460_v20  ;;  %v569_v18 = vld [vmem:[#allocation11 + $0x7c0] sm:$0xff]  ;;  %v510_v19 = vld [vmem:[#allocation11 + $0x5e8] sm:$0xff] }
 0x14b   :  { %809 = vmatpush.msra.mxu3 %v397_v21  ;;  %849 = vmatpush.msrb.mxu2 %v398_v22  ;;  %v570_v20 = vld [vmem:[#allocation11 + $0x7c8] sm:$0xff]  ;;  %v497_v21 = vld [vmem:[#allocation11 + $0x580] sm:$0xff] }
 0x14c   :  { %885 = vmatpush.msrb.mxu1 %v447_v23  ;;  %925 = vmatpush.msra.mxu0 %v448_v24  ;;  %v557_v22 = vld [vmem:[#allocation11 + $0x760] sm:$0xff]  ;;  %v498_v23 = vld [vmem:[#allocation11 + $0x588] sm:$0xff] }
 0x14d   :  { %810 = vmatpush.msra.mxu3 %v385_v25  ;;  %850 = vmatpush.msrb.mxu2 %v386_v26  ;;  %v558_v24 = vld [vmem:[#allocation11 + $0x768] sm:$0xff]  ;;  %v485_v25 = vld [vmem:[#allocation11 + $0x520] sm:$0xff] }
 0x14e   :  { %886 = vmatpush.msrb.mxu1 %v435_v27  ;;  %926 = vmatpush.msra.mxu0 %v436_v28  ;;  %v545_v26 = vld [vmem:[#allocation11 + $0x700] sm:$0xff]  ;;  %v486_v27 = vld [vmem:[#allocation11 + $0x528] sm:$0xff] }
 0x14f   :  { %811 = vmatpush.msra.mxu3 %v373_v29  ;;  %851 = vmatpush.msrb.mxu2 %v374_v30  ;;  %v546_v28 = vld [vmem:[#allocation11 + $0x708] sm:$0xff]  ;;  %v473_v29 = vld [vmem:[#allocation11 + $0x4c0] sm:$0xff] }
 0x150   :  { %887 = vmatpush.msrb.mxu1 %v423_v31  ;;  %927 = vmatpush.msra.mxu0 %v424_v32  ;;  %v533_v30 = vld [vmem:[#allocation11 + $0x6a0] sm:$0xff]  ;;  %v474_v31 = vld [vmem:[#allocation11 + $0x4c8] sm:$0xff] }
 0x151   :  { %812 = vmatpush.msra.mxu3 %v361_v33  ;;  %852 = vmatpush.msrb.mxu2 %v362_v34  ;;  %v534_v32 = vld [vmem:[#allocation11 + $0x6a8] sm:$0xff]  ;;  %v461_v33 = vld [vmem:[#allocation11 + $0x460] sm:$0xff] }
 0x152   :  { %888 = vmatpush.msrb.mxu1 %v411_v36  ;;  %928 = vmatpush.msra.mxu0 %v412_v37  ;;  %v521_v34 = vld [vmem:[#allocation11 + $0x640] sm:$0xff]  ;;  %v462_v36 = vld [vmem:[#allocation11 + $0x468] sm:$0xff] }
 0x153   :  { %813 = vmatpush.msra.mxu3 %v349_v38  ;;  %853 = vmatpush.msrb.mxu2 %v350_v39  ;;  %v522_v37 = vld [vmem:[#allocation11 + $0x648] sm:$0xff]  ;;  %v511_v38 = vld [vmem:[#allocation11 + $0x5f0] sm:$0xff]  ;;  %v512_v39 = vld [vmem:[#allocation11 + $0x5f8] sm:$0xff] }
 0x154   :  { %889 = vmatpush.msrb.mxu1 %v399_v40  ;;  %929 = vmatpush.msra.mxu0 %v400_v41  ;;  %v449_v40 = vld [vmem:[#allocation11 + $0x400] sm:$0xff]  ;;  %v450_v41 = vld [vmem:[#allocation11 + $0x408] sm:$0xff] }
 0x155   :  { %814 = vmatpush.msra.mxu3 %v337_v42  ;;  %854 = vmatpush.msrb.mxu2 %v338_v43  ;;  %v499_v42 = vld [vmem:[#allocation11 + $0x590] sm:$0xff]  ;;  %v500_v43 = vld [vmem:[#allocation11 + $0x598] sm:$0xff] }
 0x156   :  { %890 = vmatpush.msrb.mxu1 %v387_v44  ;;  %930 = vmatpush.msra.mxu0 %v388_v45  ;;  %v437_v44 = vld [vmem:[#allocation11 + $0x3a0] sm:$0xff]  ;;  %v438_v45 = vld [vmem:[#allocation11 + $0x3a8] sm:$0xff] }
 0x157   :  { %815 = vmatpush.msra.mxu3 %v325_v47  ;;  %855 = vmatpush.msrb.mxu2 %v326_v48  ;;  %v487_v47 = vld [vmem:[#allocation11 + $0x530] sm:$0xff]  ;;  %v488_v48 = vld [vmem:[#allocation11 + $0x538] sm:$0xff] }
 0x158   :  { %816 = vmatmul.f32.vlgmr.msra.gmra.mxu3 %v1463_v46  ;;  %856 = vmatmul.f32.vlgmr.msrb.gmra.mxu2 %v1463_v46 }
 0x159   :  { %891 = vmatpush.msrb.mxu1 %v375_v49  ;;  %908 = vmatpush.msrb.mxu3 %v603_v50  ;;  %v425_v49 = vld [vmem:[#allocation11 + $0x340] sm:$0xff]  ;;  %v426_v50 = vld [vmem:[#allocation11 + $0x348] sm:$0xff] }
 0x15a   :  { %931 = vmatpush.msra.mxu0 %v376_v51  ;;  %948 = vmatpush.msra.mxu2 %v604_v52  ;;  %v475_v51 = vld [vmem:[#allocation11 + $0x4d0] sm:$0xff]  ;;  %v476_v52 = vld [vmem:[#allocation11 + $0x4d8] sm:$0xff] }
 0x15b   :  { %892 = vmatpush.msrb.mxu1 %v363_v53  ;;  %909 = vmatpush.msrb.mxu3 %v591_v54  ;;  %v413_v53 = vld [vmem:[#allocation11 + $0x2e0] sm:$0xff]  ;;  %v414_v54 = vld [vmem:[#allocation11 + $0x2e8] sm:$0xff] }
 0x15c   :  { %932 = vmatpush.msra.mxu0 %v364_v55  ;;  %949 = vmatpush.msra.mxu2 %v592_v56  ;;  %v463_v55 = vld [vmem:[#allocation11 + $0x470] sm:$0xff]  ;;  %v464_v56 = vld [vmem:[#allocation11 + $0x478] sm:$0xff] }
 0x15d   :  { %893 = vmatpush.msrb.mxu1 %v351_v57  ;;  %910 = vmatpush.msrb.mxu3 %v579_v58  ;;  %v401_v57 = vld [vmem:[#allocation11 + $0x280] sm:$0xff]  ;;  %v402_v58 = vld [vmem:[#allocation11 + $0x288] sm:$0xff] }
 0x15e   :  { %933 = vmatpush.msra.mxu0 %v352_v59  ;;  %950 = vmatpush.msra.mxu2 %v580_v60  ;;  %v451_v59 = vld [vmem:[#allocation11 + $0x410] sm:$0xff]  ;;  %v452_v60 = vld [vmem:[#allocation11 + $0x418] sm:$0xff] }
 0x15f   :  { %894 = vmatpush.msrb.mxu1 %v339_v61  ;;  %911 = vmatpush.msrb.mxu3 %v567_v62  ;;  %v389_v61 = vld [vmem:[#allocation11 + $0x220] sm:$0xff]  ;;  %v390_v62 = vld [vmem:[#allocation11 + $0x228] sm:$0xff] }
 0x160   :  { %934 = vmatpush.msra.mxu0 %v340_v63  ;;  %951 = vmatpush.msra.mxu2 %v568_v0  ;;  %v439_v63 = vld [vmem:[#allocation11 + $0x3b0] sm:$0xff]  ;;  %v440_v0 = vld [vmem:[#allocation11 + $0x3b8] sm:$0xff] }
 0x161   :  { %895 = vmatpush.msrb.mxu1 %v327_v1  ;;  %912 = vmatpush.msrb.mxu3 %v555_v2  ;;  %v377_v1 = vld [vmem:[#allocation11 + $0x1c0] sm:$0xff]  ;;  %v378_v2 = vld [vmem:[#allocation11 + $0x1c8] sm:$0xff] }
 0x162   :  { %935 = vmatpush.msra.mxu0 %v328_v3  ;;  %952 = vmatpush.msra.mxu2 %v556_v4  ;;  %v427_v3 = vld [vmem:[#allocation11 + $0x350] sm:$0xff]  ;;  %v428_v4 = vld [vmem:[#allocation11 + $0x358] sm:$0xff] }
 0x163   :  { %896 = vmatmul.f32.vlgmr.msrb.gmra.mxu1 %v1463_v46  ;;  %936 = vmatmul.f32.vlgmr.msra.gmra.mxu0 %v1463_v46 }
 0x164   :  { %988 = vmatpush.msra.mxu1 %v605_v5  ;;  %1028 = vmatpush.msrb.mxu0 %v606_v6  ;;  %v365_v5 = vld [vmem:[#allocation11 + $0x160] sm:$0xff]  ;;  %v366_v6 = vld [vmem:[#allocation11 + $0x168] sm:$0xff] }
 0x165   :  { %913 = vmatpush.msrb.mxu3 %v543_v7  ;;  %953 = vmatpush.msra.mxu2 %v544_v8  ;;  %v415_v7 = vld [vmem:[#allocation11 + $0x2f0] sm:$0xff]  ;;  %v416_v8 = vld [vmem:[#allocation11 + $0x2f8] sm:$0xff] }
 0x166   :  { %989 = vmatpush.msra.mxu1 %v593_v9  ;;  %1029 = vmatpush.msrb.mxu0 %v594_v10  ;;  %v353_v9 = vld [vmem:[#allocation11 + $0x100] sm:$0xff]  ;;  %v354_v10 = vld [vmem:[#allocation11 + $0x108] sm:$0xff] }
 0x167   :  { %914 = vmatpush.msrb.mxu3 %v531_v11  ;;  %954 = vmatpush.msra.mxu2 %v532_v12  ;;  %v403_v11 = vld [vmem:[#allocation11 + $0x290] sm:$0xff]  ;;  %v404_v12 = vld [vmem:[#allocation11 + $0x298] sm:$0xff] }
 0x168   :  { %990 = vmatpush.msra.mxu1 %v581_v13  ;;  %1030 = vmatpush.msrb.mxu0 %v582_v14  ;;  %v341_v13 = vld [vmem:[#allocation11 + $0xa0] sm:$0xff]  ;;  %v342_v14 = vld [vmem:[#allocation11 + $0xa8] sm:$0xff] }
 0x169   :  { %915 = vmatpush.msrb.mxu3 %v519_v15  ;;  %955 = vmatpush.msra.mxu2 %v520_v16  ;;  %v391_v15 = vld [vmem:[#allocation11 + $0x230] sm:$0xff]  ;;  %v392_v16 = vld [vmem:[#allocation11 + $0x238] sm:$0xff] }
 0x16a   :  { %1162 = vmatmul.msk.f32.vlgmr.msrb.gmra.mxu3 %vm235_vm1, %v1457_v35  ;;  %1163 = vmatmul.msk.f32.vlgmr.msra.gmra.mxu2 %vm235_vm1, %v1457_v35 }
 0x16b   :  { %960 = vmatpush.msra.mxu3 %v509_v17  ;;  %991 = vmatpush.msra.mxu1 %v569_v18  ;;  %v329_v17 = vld [vmem:[#allocation11 + $0x40] sm:$0xff]  ;;  %v330_v18 = vld [vmem:[#allocation11 + $0x48] sm:$0xff] }
 0x16c   :  { %1000 = vmatpush.msrb.mxu2 %v510_v19  ;;  %1031 = vmatpush.msrb.mxu0 %v570_v20  ;;  %v379_v19 = vld [vmem:[#allocation11 + $0x1d0] sm:$0xff] }
 0x16d   :  { %961 = vmatpush.msra.mxu3 %v497_v21  ;;  %992 = vmatpush.msra.mxu1 %v557_v22  ;;  %v607_v20 = vld [vmem:[#allocation11 + $0x8f0] sm:$0xff]  ;;  %v380_v21 = vld [vmem:[#allocation11 + $0x1d8] sm:$0xff] }
 0x16e   :  { %1001 = vmatpush.msrb.mxu2 %v498_v23  ;;  %1032 = vmatpush.msrb.mxu0 %v558_v24  ;;  %v608_v22 = vld [vmem:[#allocation11 + $0x8f8] sm:$0xff]  ;;  %v367_v23 = vld [vmem:[#allocation11 + $0x170] sm:$0xff] }
 0x16f   :  { %962 = vmatpush.msra.mxu3 %v485_v25  ;;  %993 = vmatpush.msra.mxu1 %v545_v26  ;;  %v595_v24 = vld [vmem:[#allocation11 + $0x890] sm:$0xff]  ;;  %v368_v25 = vld [vmem:[#allocation11 + $0x178] sm:$0xff] }
 0x170   :  { %1002 = vmatpush.msrb.mxu2 %v486_v27  ;;  %1033 = vmatpush.msrb.mxu0 %v546_v28  ;;  %v596_v26 = vld [vmem:[#allocation11 + $0x898] sm:$0xff]  ;;  %v355_v27 = vld [vmem:[#allocation11 + $0x110] sm:$0xff] }
 0x171   :  { %963 = vmatpush.msra.mxu3 %v473_v29  ;;  %994 = vmatpush.msra.mxu1 %v533_v30  ;;  %v583_v28 = vld [vmem:[#allocation11 + $0x830] sm:$0xff]  ;;  %v356_v29 = vld [vmem:[#allocation11 + $0x118] sm:$0xff] }
 0x172   :  { %1003 = vmatpush.msrb.mxu2 %v474_v31  ;;  %1034 = vmatpush.msrb.mxu0 %v534_v32  ;;  %v584_v30 = vld [vmem:[#allocation11 + $0x838] sm:$0xff]  ;;  %v343_v31 = vld [vmem:[#allocation11 + $0xb0] sm:$0xff] }
 0x173   :  { %964 = vmatpush.msra.mxu3 %v461_v33  ;;  %995 = vmatpush.msra.mxu1 %v521_v34  ;;  %v571_v32 = vld [vmem:[#allocation11 + $0x7d0] sm:$0xff]  ;;  %v344_v33 = vld [vmem:[#allocation11 + $0xb8] sm:$0xff] }
 0x174   :  { %1004 = vmatpush.msrb.mxu2 %v462_v36  ;;  %1035 = vmatpush.msrb.mxu0 %v522_v37  ;;  %v572_v34 = vld [vmem:[#allocation11 + $0x7d8] sm:$0xff]  ;;  %v331_v36 = vld [vmem:[#allocation11 + $0x50] sm:$0xff] }
 0x175   :  { %1164 = vmatmul.msk.f32.vlgmr.msra.gmra.mxu1 %vm235_vm1, %v1457_v35  ;;  %1165 = vmatmul.msk.f32.vlgmr.msrb.gmra.mxu0 %vm235_vm1, %v1457_v35  ;;  %v559_v37 = vld [vmem:[#allocation11 + $0x770] sm:$0xff] }
 0x176   :  { %1040 = vmatpush.msrb.mxu1 %v511_v38  ;;  %1080 = vmatpush.msra.mxu0 %v512_v39  ;;  %v332_v38 = vld [vmem:[#allocation11 + $0x58] sm:$0xff] }
 0x177   :  { %965 = vmatpush.msra.mxu3 %v449_v40  ;;  %1005 = vmatpush.msrb.mxu2 %v450_v41  ;;  %v560_v39 = vld [vmem:[#allocation11 + $0x778] sm:$0xff]  ;;  %v547_v40 = vld [vmem:[#allocation11 + $0x710] sm:$0xff] }
 0x178   :  { %1041 = vmatpush.msrb.mxu1 %v499_v42  ;;  %1081 = vmatpush.msra.mxu0 %v500_v43  ;;  %v548_v41 = vld [vmem:[#allocation11 + $0x718] sm:$0xff]  ;;  %v535_v42 = vld [vmem:[#allocation11 + $0x6b0] sm:$0xff] }
 0x179   :  { %966 = vmatpush.msra.mxu3 %v437_v44  ;;  %1006 = vmatpush.msrb.mxu2 %v438_v45  ;;  %v536_v43 = vld [vmem:[#allocation11 + $0x6b8] sm:$0xff]  ;;  %v523_v44 = vld [vmem:[#allocation11 + $0x650] sm:$0xff] }
 0x17a   :  { %1042 = vmatpush.msrb.mxu1 %v487_v47  ;;  %1082 = vmatpush.msra.mxu0 %v488_v48  ;;  %v524_v45 = vld [vmem:[#allocation11 + $0x658] sm:$0xff] }
 0x17b   :  { %967 = vmatpush.msra.mxu3 %v425_v49  ;;  %1007 = vmatpush.msrb.mxu2 %v426_v50  ;;  %v609_v49 = vld [vmem:[#allocation13] sm:$0xff] }
 0x17c   :  { %1043 = vmatpush.msrb.mxu1 %v475_v51  ;;  %1083 = vmatpush.msra.mxu0 %v476_v52  ;;  %v614_v50 = vperm.slane %v609_v49, 1 }
 0x17d   :  { %968 = vmatpush.msra.mxu3 %v413_v53  ;;  %1008 = vmatpush.msrb.mxu2 %v414_v54 }
 0x17e   :  { %1044 = vmatpush.msrb.mxu1 %v463_v55  ;;  %1084 = vmatpush.msra.mxu0 %v464_v56 }
 0x17f   :  { %969 = vmatpush.msra.mxu3 %v401_v57  ;;  %1009 = vmatpush.msrb.mxu2 %v402_v58  ;;  %v615_v57 = vperm.slane %v609_v49, 2  ;;  %v616_v58 = vperm.slane %v609_v49, 3 }
 0x180   :  { %1045 = vmatpush.msrb.mxu1 %v451_v59  ;;  %1085 = vmatpush.msra.mxu0 %v452_v60 }
 0x181   :  { %970 = vmatpush.msra.mxu3 %v389_v61  ;;  %1010 = vmatpush.msrb.mxu2 %v390_v62 }
 0x182   :  { %1046 = vmatpush.msrb.mxu1 %v439_v63  ;;  %1086 = vmatpush.msra.mxu0 %v440_v0 }
 0x183   :  { %971 = vmatpush.msra.mxu3 %v377_v1  ;;  %1011 = vmatpush.msrb.mxu2 %v378_v2  ;;  %v617_v2 = vperm.slane %v609_v49, 4 }
 0x184   :  { %1047 = vmatpush.msrb.mxu1 %v427_v3  ;;  %1087 = vmatpush.msra.mxu0 %v428_v4  ;;  %v618_v3 = vperm.slane %v609_v49, 5 }
 0x185   :  { %972 = vmatpush.msra.mxu3 %v365_v5  ;;  %1012 = vmatpush.msrb.mxu2 %v366_v6 }
 0x186   :  { %1048 = vmatpush.msrb.mxu1 %v415_v7  ;;  %1088 = vmatpush.msra.mxu0 %v416_v8 }
 0x187   :  { %973 = vmatpush.msra.mxu3 %v353_v9  ;;  %1013 = vmatpush.msrb.mxu2 %v354_v10 }
 0x188   :  { %1049 = vmatpush.msrb.mxu1 %v403_v11  ;;  %1089 = vmatpush.msra.mxu0 %v404_v12  ;;  %v619_v12 = vperm.slane %v609_v49, 6 }
 0x189   :  { %974 = vmatpush.msra.mxu3 %v341_v13  ;;  %1014 = vmatpush.msrb.mxu2 %v342_v14  ;;  %v620_v13 = vperm.slane %v609_v49, 7 }
 0x18a   :  { %1050 = vmatpush.msrb.mxu1 %v391_v15  ;;  %1090 = vmatpush.msra.mxu0 %v392_v16 }
 0x18b   :  { %975 = vmatpush.msra.mxu3 %v329_v17  ;;  %1015 = vmatpush.msrb.mxu2 %v330_v18 }
 0x18c   :  { %976 = vmatmul.f32.vlgmr.msra.gmra.mxu3 %v1463_v46  ;;  %1016 = vmatmul.f32.vlgmr.msrb.gmra.mxu2 %v1463_v46 }
 0x18d   :  { %1051 = vmatpush.msrb.mxu1 %v379_v19  ;;  %1068 = vmatpush.msrb.mxu3 %v607_v20 }
 0x18e   :  { %1091 = vmatpush.msra.mxu0 %v380_v21  ;;  %1108 = vmatpush.msra.mxu2 %v608_v22  ;;  %v610_v22 = vld [vmem:[#allocation13 + $0x8] sm:$0xf] }
 0x18f   :  { %1052 = vmatpush.msrb.mxu1 %v367_v23  ;;  %1069 = vmatpush.msrb.mxu3 %v595_v24  ;;  %v621_v23 = vperm.slane %v610_v22, 0  ;;  %v622_v24 = vperm.slane %v610_v22, 1 }
 0x190   :  { %1092 = vmatpush.msra.mxu0 %v368_v25  ;;  %1109 = vmatpush.msra.mxu2 %v596_v26 }
 0x191   :  { %1053 = vmatpush.msrb.mxu1 %v355_v27  ;;  %1070 = vmatpush.msrb.mxu3 %v583_v28 }
 0x192   :  { %1093 = vmatpush.msra.mxu0 %v356_v29  ;;  %1110 = vmatpush.msra.mxu2 %v584_v30 }
 0x193   :  { %1054 = vmatpush.msrb.mxu1 %v343_v31  ;;  %1071 = vmatpush.msrb.mxu3 %v571_v32 }
 0x194   :  { %1094 = vmatpush.msra.mxu0 %v344_v33  ;;  %1111 = vmatpush.msra.mxu2 %v572_v34  ;;  %v623_v33 = vperm.slane %v610_v22, 2  ;;  %v624_v34 = vperm.slane %v610_v22, 3 }
 0x195   :  { %1055 = vmatpush.msrb.mxu1 %v331_v36  ;;  %1072 = vmatpush.msrb.mxu3 %v559_v37 }
 0x196   :  { %1095 = vmatpush.msra.mxu0 %v332_v38  ;;  %1112 = vmatpush.msra.mxu2 %v560_v39 }
 0x197   :  { %1056 = vmatmul.f32.vlgmr.msrb.gmra.mxu1 %v1463_v46  ;;  %1096 = vmatmul.f32.vlgmr.msra.gmra.mxu0 %v1463_v46  ;;  %v613_v46 = vperm.slane %v609_v49, 0 }
 0x198   :  { %1073 = vmatpush.msrb.mxu3 %v547_v40  ;;  %1113 = vmatpush.msra.mxu2 %v548_v41 }
 0x19a   :  { %1074 = vmatpush.msrb.mxu3 %v535_v42  ;;  %1114 = vmatpush.msra.mxu2 %v536_v43 }
 0x19c   :  { %1075 = vmatpush.msrb.mxu3 %v523_v44  ;;  %1115 = vmatpush.msra.mxu2 %v524_v45 }
 0x19d   :  { %1166 = vmatmul.msk.f32.vlgmr.msrb.gmra.mxu3 %vm235_vm1, %v1457_v35  ;;  %1167 = vmatmul.msk.f32.vlgmr.msra.gmra.mxu2 %vm235_vm1, %v1457_v35 }
 0x1ab   :  { %v677_v47 = vpop.f32.mrf.mxu1  ;;  %v717_v48 = vpop.f32.mrf.mxu0 }
 0x1b4   :  { %v737_v59 = vpop.f32.mrf.mxu1  ;;  %v777_v60 = vpop.f32.mrf.mxu0 }
 0x1b5   :  { %v738_v61 = vadd.f32 %v737_v59, %v615_v57  ;;  %v778_v62 = vadd.f32 %v777_v60, %v616_v58 }
 0x1b7   :  { %v657_v51 = vpop.f32.mrf.mxu3  ;;  %v697_v52 = vpop.f32.mrf.mxu2 }
 0x1b8   :  { %v658_v53 = vadd.f32 %v657_v51, %v613_v46  ;;  %v698_v54 = vadd.f32 %v697_v52, %v614_v50 }
 0x1ba   :  { %v678_v55 = vadd.f32 %v677_v47, %v658_v53  ;;  %v718_v56 = vadd.f32 %v717_v48, %v698_v54 }
 0x1bc   :  { %1120 = vst [vmem:[#allocation14] sm:$0xff] %v678_v55 }
 0x1bd   :  { %1121 = vst [vmem:[#allocation14 + $0x8] sm:$0xff] %v718_v56 }
 0x1bf   :  { %v837_v8 = vpop.f32.mrf.mxu1 }
 0x1c0   :  { %v877_v9 = vpop.f32.mrf.mxu0 }
 0x1c1   :  { %v757_v35 = vpop.f32.mrf.mxu3  ;;  %v797_v63 = vpop.f32.mrf.mxu2 }
 0x1c2   :  { %v758_v0 = vadd.f32 %v757_v35, %v738_v61  ;;  %v798_v1 = vadd.f32 %v797_v63, %v778_v62 }
 0x1c4   :  { %1122 = vst [vmem:[#allocation14 + $0x10] sm:$0xff] %v758_v0 }
 0x1c5   :  { %1123 = vst [vmem:[#allocation14 + $0x18] sm:$0xff] %v798_v1 }
 0x1db   :  { %v817_v4 = vpop.f32.mrf.mxu3  ;;  %v857_v5 = vpop.f32.mrf.mxu2 }
 0x1dc   :  { %v818_v6 = vadd.f32 %v817_v4, %v617_v2  ;;  %v858_v7 = vadd.f32 %v857_v5, %v618_v3 }
 0x1de   :  { %v838_v10 = vadd.f32 %v837_v8, %v818_v6  ;;  %v878_v11 = vadd.f32 %v877_v9, %v858_v7 }
 0x1e0   :  { %1124 = vst [vmem:[#allocation14 + $0x20] sm:$0xff] %v838_v10  ;;  %v897_v14 = vpop.f32.mrf.mxu1  ;;  %v937_v15 = vpop.f32.mrf.mxu0 }
 0x1e1   :  { %1125 = vst [vmem:[#allocation14 + $0x28] sm:$0xff] %v878_v11  ;;  %v898_v16 = vadd.f32 %v897_v14, %v619_v12  ;;  %v938_v17 = vadd.f32 %v937_v15, %v620_v13 }
 0x1ed   :  { %v917_v18 = vpop.f32.mrf.mxu3  ;;  %v957_v19 = vpop.f32.mrf.mxu2 }
 0x1ee   :  { %v918_v20 = vadd.f32 %v917_v18, %v898_v16  ;;  %v958_v21 = vadd.f32 %v957_v19, %v938_v17 }
 0x1f0   :  { %1126 = vst [vmem:[#allocation14 + $0x30] sm:$0xff] %v918_v20 }
 0x1f1   :  { %1127 = vst [vmem:[#allocation14 + $0x38] sm:$0xff] %v958_v21 }
 0x1f2   :  { %v997_v29 = vpop.f32.mrf.mxu1  ;;  %v1037_v30 = vpop.f32.mrf.mxu0 }
 0x20f   :  { %v977_v25 = vpop.f32.mrf.mxu3  ;;  %v1017_v26 = vpop.f32.mrf.mxu2 }
 0x210   :  { %v978_v27 = vadd.f32 %v977_v25, %v621_v23  ;;  %v1018_v28 = vadd.f32 %v1017_v26, %v622_v24 }
 0x212   :  { %v998_v31 = vadd.f32 %v997_v29, %v978_v27  ;;  %v1038_v32 = vadd.f32 %v1037_v30, %v1018_v28 }
 0x214   :  { %1128 = vst [vmem:[#allocation14 + $0x40] sm:$0xff] %v998_v31  ;;  %v1057_v36 = vpop.f32.mrf.mxu1  ;;  %v1097_v37 = vpop.f32.mrf.mxu0 }
 0x215   :  { %1129 = vst [vmem:[#allocation14 + $0x48] sm:$0xff] %v1038_v32  ;;  %v1058_v38 = vadd.f32 %v1057_v36, %v623_v33  ;;  %v1098_v39 = vadd.f32 %v1097_v37, %v624_v34 }
 0x220   :  { %v1077_v40 = vpop.f32.mrf.mxu3  ;;  %v1117_v41 = vpop.f32.mrf.mxu2 }
 0x221   :  { %v1078_v42 = vadd.f32 %v1077_v40, %v1058_v38  ;;  %v1118_v43 = vadd.f32 %v1117_v41, %v1098_v39 }
 0x223   :  { %1130 = vst [vmem:[#allocation14 + $0x50] sm:$0xff] %v1078_v42 }
 0x224   :  { %1131 = vst [vmem:[#allocation14 + $0x58] sm:$0xff] %v1118_v43 }
 0x225   :  { %1142 = dma.vmem_to_hbm [thread:$0]  %s1138_s6, 1536, %s1140_s14, [#allocation4]  }
 0x226   :  { %1380 = dma.done.wait [#allocation4], 1536  }
 0x227   :  { %1381 = vsyncadd [#allocation4], 4294965760 }
 0x228   :  { %1147 = vsyncpa [#allocation3], 1 }
 0x229   :  { %1148 = vsyncpa [#allocation6], 1 }
 0x22a   :  { %1149 = vsyncpa [#allocation9], 1 }
 0x22b   :  { %1150 = vsyncpa [#allocation12], 1 }
 0x22c   :  { %1151 = vsyncpa [#allocation4], 1 }

</bundles_post_ra>
